<compile_context>
chip_gen: v7x
topology: tpu7x:2x2x1
jax: 0.10.0
libtpu: 0.0.40
codegen_flags: <defaults>
</compile_context>

<pallas_src>
import functools

import jax
import jax.numpy as jnp
from jax.experimental import pallas as pl
from jax.experimental.pallas import tpu as pltpu

# opt.beta is a CLI hyperparameter in the original script; fixed here.
BETA = 1.0

_LANE = 128                      # lane width: batch tiles are multiples of this
_MAX_TILE_N = 32768              # hard cap on batch columns per grid step
_VMEM_INPUT_BUDGET = 8 << 20     # bytes for double-buffered pred+proba blocks
_NCORES = 2                      # leading "parallel" axis; engages 2nd TC on v7x


def _round_up(x, m):
    return (x + m - 1) // m * m


def _loss_max_kernel(pred_ref, truth_ref, proba_ref, out_ref, *,
                     n_valid, n_classes, beta, tiles_per_core):
    core = pl.program_id(0)
    t_idx = pl.program_id(1)

    @pl.when(t_idx == 0)
    def _():
        out_ref[...] = jnp.zeros_like(out_ref)

    pred = pred_ref[...].astype(jnp.float32)       # [C, T]  classes x batch
    proba = proba_ref[...].astype(jnp.float32)     # [C, T]
    truth = truth_ref[...]                         # [1, T]  int32 class ids
    c, t = pred.shape

    # Columns covered by this step.  The index_map clamps the *data* block to
    # stay in range; the mask here (built from the unclamped global index)
    # zeroes both the partial tail of the last real block and any fully
    # duplicated out-of-range blocks.
    global_blk = core * tiles_per_core + t_idx
    col = jax.lax.broadcasted_iota(jnp.int32, (1, t), 1) + global_blk * t
    valid = col < n_valid                          # [1, T] bool

    # --- numerically stable softmax along classes (sublanes) ----------------
    m = jnp.max(pred, axis=0, keepdims=True)                 # [1, T]
    z = pred - m                                             # [C, T]
    ez = jnp.exp(z)                                          # [C, T]
    se = jnp.sum(ez, axis=0, keepdims=True)                  # [1, T]
    log_se = jnp.log(se)                                     # [1, T]
    softmax = ez * pl.reciprocal(se, approx=True)            # EUP slot, ~free

    # --- cross-entropy without materializing log_softmax / float one-hot ----
    #   -log_softmax[truth] = log(sum_exp) - z[truth]
    row_ids = jax.lax.broadcasted_iota(jnp.int32, (c, t), 0)
    z_truth = jnp.sum(jnp.where(row_ids == truth, z, 0.0),
                      axis=0, keepdims=True)                 # [1, T]
    ce_per_col = log_se - z_truth                            # [1, T]

    # --- MSE(softmax(pred), proba) per column --------------------------------
    diff = softmax - proba
    mse_per_col = jnp.sum(diff * diff, axis=0, keepdims=True)  # [1, T]

    # Fused, pre-normalized per-column contribution (full-batch counts), then a
    # single NaN-safe masked cross-lane reduction into the resident output.
    per_col = (ce_per_col * (1.0 / n_valid) +
               mse_per_col * (beta / (n_valid * n_classes)))
    per_col = jnp.where(valid, per_col, 0.0)
    partial = jnp.sum(per_col, axis=1, keepdims=True)          # (1, 1)
    out_ref[...] += partial.reshape(1, 1, 1)


def loss_max(pred, truth, proba, beta=BETA, tile_n=None):
    """pred: [N, C] logits (any float dtype), truth: [N] int class ids,
    proba: [N, C] target probabilities. Returns scalar exp(-(CE + beta*MSE))."""
    n, c = pred.shape
    itemsize = jnp.dtype(pred.dtype).itemsize

    if tile_n is None:
        # Largest lane tile whose double-buffered pred+proba blocks fit a
        # conservative VMEM budget (fits v5e's 16 MiB scoped default and v7x's
        # 64 MiB physical with plenty of headroom).
        c_pad = _round_up(c, 8)
        per_lane = 2 * 2 * c_pad * itemsize        # 2 arrays x 2 pipeline bufs
        cap = max(_LANE, (_VMEM_INPUT_BUDGET // per_lane) // _LANE * _LANE)
        tile_n = min(_round_up(n, _LANE), cap, _MAX_TILE_N)
    tile_n = max(_LANE, _round_up(tile_n, _LANE))

    n_blocks = pl.cdiv(n, tile_n)
    tiles_per_core = pl.cdiv(n_blocks, _NCORES)
    grid = (_NCORES, tiles_per_core)

    # Lane-dense [C, N] layout; no padding (partial blocks are masked in-kernel).
    # TODO(synk): produce the [C, N] layout upstream (fold the transpose into
    # the producing matmul / use allow_input_fusion) so this wrapper transpose
    # disappears from the HBM traffic entirely.
    pred_t = pred.T
    proba_t = proba.T
    truth_row = truth.astype(jnp.int32).reshape(1, n)

    def data_map(ci, ti):
        # Clamp so out-of-range (duplicated) blocks still DMA in-bounds data;
        # the kernel masks their contribution to exactly zero.
        return (0, jnp.minimum(ci * tiles_per_core + ti, n_blocks - 1))

    kernel = functools.partial(
        _loss_max_kernel, n_valid=n, n_classes=c, beta=float(beta),
        tiles_per_core=tiles_per_core)

    partials = pl.pallas_call(
        kernel,
        out_shape=jax.ShapeDtypeStruct((_NCORES, 1, 1), jnp.float32),
        grid_spec=pltpu.PrefetchScalarGridSpec(
            num_scalar_prefetch=0,
            grid=grid,
            in_specs=[
                pl.BlockSpec((c, tile_n), data_map),   # pred   [C, N]
                pl.BlockSpec((1, tile_n), data_map),   # truth  [1, N]
                pl.BlockSpec((c, tile_n), data_map),   # proba  [C, N]
            ],
            out_specs=pl.BlockSpec((1, 1, 1), lambda ci, ti: (ci, 0, 0)),
        ),
        compiler_params=pltpu.CompilerParams(
            dimension_semantics=("parallel", "arbitrary")),
    )(pred_t, truth_row, proba_t)

    # exp(-loss) does not distribute over the per-core partial sums, so finish
    # with scalar-sized work outside the kernel.
    return jnp.exp(-jnp.sum(partials))


def loss_max_ref(pred, truth, proba, beta=BETA):
    """Pure-JAX reference mirroring the PyTorch semantics."""
    pred = pred.astype(jnp.float32)
    proba = proba.astype(jnp.float32)
    logp = jax.nn.log_softmax(pred, axis=1)
    ce = -jnp.mean(jnp.take_along_axis(logp, truth[:, None].astype(jnp.int32), axis=1))
    mse = jnp.mean((jax.nn.softmax(pred, axis=1) - proba) ** 2)
    return jnp.exp(-(ce + mse * beta))


if __name__ == "__main__":
    key = jax.random.PRNGKey(0)
    k1, k2, k3 = jax.random.split(key, 3)

    # Small demo shapes (CIFAR-10-like: few classes, small batch).
    N, C = 8, 16
    pred = jax.random.normal(k1, (N, C), dtype=jnp.float32)
    truth = jax.random.randint(k2, (N,), 0, C, dtype=jnp.int32)
    proba = jax.nn.softmax(jax.random.normal(k3, (N, C), dtype=jnp.float32), axis=1)

    out = loss_max(pred, truth, proba)
    jax.block_until_ready(out)
    ref = loss_max_ref(pred, truth, proba)
    assert jnp.allclose(out, ref, rtol=1e-3, atol=1e-4), (out, ref)

    # Multi-tile path: un-padded partial last block, several grid steps across
    # both "cores", bf16 inputs.
    k4, k5, k6 = jax.random.split(jax.random.PRNGKey(1), 3)
    N2, C2 = 300, 10
    pred2 = jax.random.normal(k4, (N2, C2), dtype=jnp.float32).astype(jnp.bfloat16)
    truth2 = jax.random.randint(k5, (N2,), 0, C2, dtype=jnp.int32)
    proba2 = jax.nn.softmax(
        jax.random.normal(k6, (N2, C2), dtype=jnp.float32), axis=1).astype(jnp.bfloat16)

    out2 = loss_max(pred2, truth2, proba2, tile_n=128)
    jax.block_until_ready(out2)
    ref2 = loss_max_ref(pred2, truth2, proba2)
    assert jnp.allclose(out2, ref2, rtol=2e-3, atol=1e-3), (out2, ref2)

    print("KERNEL_OK")
</pallas_src>

<mosaic_0001>
module attributes {stable_mosaic.version = 11 : i64} {
  func.func @_loss_max_kernel(%arg0: i32, %arg1: i32, %arg2: memref<16x128xf32, #tpu.memory_space<vmem>>, %arg3: memref<1x128xi32, #tpu.memory_space<vmem>>, %arg4: memref<16x128xf32, #tpu.memory_space<vmem>>, %arg5: memref<1x1x1xf32, #tpu.memory_space<vmem>>) attributes {dimension_semantics = [#tpu.dimension_semantics<parallel>, #tpu.dimension_semantics<arbitrary>], iteration_bounds = array<i64: 2, 1>, scalar_prefetch = 0 : i64, scratch_operands = 0 : i64, tpu.core_type = #tpu.core_type<tc>, window_params = [{transform_indices = @transform_0, window_bounds = array<i64: 16, 128>}, {transform_indices = @transform_1, window_bounds = array<i64: 1, 128>}, {transform_indices = @transform_2, window_bounds = array<i64: 16, 128>}, {transform_indices = @transform_3, window_bounds = array<i64: 1, 1, 1>}]} {
    %c0_i32 = arith.constant 0 : i32
    %0 = arith.cmpi eq, %arg1, %c0_i32 : i32
    %1 = arith.extui %0 : i1 to i32
    %c0_i32_0 = arith.constant 0 : i32
    %2 = arith.cmpi ne, %1, %c0_i32_0 : i32
    scf.if %2 {
      %cst_20 = arith.constant 0.000000e+00 : f32
      %50 = vector.broadcast %cst_20 : f32 to vector<1x1x1xf32>
      %c0_21 = arith.constant 0 : index
      %c0_22 = arith.constant 0 : index
      %c0_23 = arith.constant 0 : index
      %51 = vector.load %arg5[%c0_21, %c0_22, %c0_23] : memref<1x1x1xf32, #tpu.memory_space<vmem>>, vector<1x1x1xf32>
      tpu.vector_store %arg5[%c0_21, %c0_22, %c0_23], %50 {strides = array<i32>} : memref<1x1x1xf32, #tpu.memory_space<vmem>>, vector<1x1x1xf32>,
    } else {
    }
    %c0 = arith.constant 0 : index
    %c0_1 = arith.constant 0 : index
    %3 = vector.load %arg2[%c0, %c0_1] : memref<16x128xf32, #tpu.memory_space<vmem>>, vector<16x128xf32>
    %c0_2 = arith.constant 0 : index
    %c0_3 = arith.constant 0 : index
    %4 = vector.load %arg4[%c0_2, %c0_3] : memref<16x128xf32, #tpu.memory_space<vmem>>, vector<16x128xf32>
    %c0_4 = arith.constant 0 : index
    %c0_5 = arith.constant 0 : index
    %5 = vector.load %arg3[%c0_4, %c0_5] : memref<1x128xi32, #tpu.memory_space<vmem>>, vector<1x128xi32>
    %c1_i32 = arith.constant 1 : i32
    %6 = arith.muli %arg0, %c1_i32 : i32
    %7 = arith.addi %6, %arg1 : i32
    %8 = tpu.iota {dimensions = array<i32: 1>} : vector<1x128xi32>
    %c128_i32 = arith.constant 128 : i32
    %9 = arith.muli %7, %c128_i32 : i32
    %10 = vector.broadcast %9 : i32 to vector<1x128xi32>
    %11 = arith.addi %8, %10 : vector<1x128xi32>
    %c8_i32 = arith.constant 8 : i32
    %12 = vector.broadcast %c8_i32 : i32 to vector<1x128xi32>
    %13 = arith.cmpi slt, %11, %12 : vector<1x128xi32>
    %cst = arith.constant dense<0xFF800000> : vector<128xf32>
    %14 = vector.multi_reduction <maximumf>, %3, %cst [0] : vector<16x128xf32> to vector<128xf32>
    %15 = vector.shape_cast %14 : vector<128xf32> to vector<1x128xf32>
    %16 = vector.broadcast %15 : vector<1x128xf32> to vector<16x128xf32>
    %17 = arith.subf %3, %16 : vector<16x128xf32>
    %18 = math.exp %17 : vector<16x128xf32>
    %cst_6 = arith.constant dense<0.000000e+00> : vector<128xf32>
    %19 = vector.multi_reduction <add>, %18, %cst_6 [0] : vector<16x128xf32> to vector<128xf32>
    %20 = vector.shape_cast %19 : vector<128xf32> to vector<1x128xf32>
    %21 = math.log %20 : vector<1x128xf32>
    %22 = tpu.reciprocal %20 {approx = true} : vector<1x128xf32> -> vector<1x128xf32>
    %23 = vector.broadcast %22 : vector<1x128xf32> to vector<16x128xf32>
    %24 = arith.mulf %18, %23 : vector<16x128xf32>
    %25 = tpu.iota {dimensions = array<i32: 0>} : vector<16x128xi32>
    %26 = vector.broadcast %5 : vector<1x128xi32> to vector<16x128xi32>
    %27 = arith.cmpi eq, %25, %26 : vector<16x128xi32>
    %cst_7 = arith.constant 0.000000e+00 : f32
    %28 = vector.broadcast %cst_7 : f32 to vector<16x128xf32>
    %29 = arith.select %27, %17, %28 : vector<16x128xi1>, vector<16x128xf32>
    %cst_8 = arith.constant dense<0.000000e+00> : vector<128xf32>
    %30 = vector.multi_reduction <add>, %29, %cst_8 [0] : vector<16x128xf32> to vector<128xf32>
    %31 = vector.shape_cast %30 : vector<128xf32> to vector<1x128xf32>
    %32 = arith.subf %21, %31 : vector<1x128xf32>
    %33 = arith.subf %24, %4 : vector<16x128xf32>
    %34 = arith.mulf %33, %33 : vector<16x128xf32>
    %cst_9 = arith.constant dense<0.000000e+00> : vector<128xf32>
    %35 = vector.multi_reduction <add>, %34, %cst_9 [0] : vector<16x128xf32> to vector<128xf32>
    %36 = vector.shape_cast %35 : vector<128xf32> to vector<1x128xf32>
    %cst_10 = arith.constant 1.250000e-01 : f32
    %37 = vector.broadcast %cst_10 : f32 to vector<1x128xf32>
    %38 = arith.mulf %32, %37 : vector<1x128xf32>
    %cst_11 = arith.constant 7.812500e-03 : f32
    %39 = vector.broadcast %cst_11 : f32 to vector<1x128xf32>
    %40 = arith.mulf %36, %39 : vector<1x128xf32>
    %41 = arith.addf %38, %40 : vector<1x128xf32>
    %cst_12 = arith.constant 0.000000e+00 : f32
    %42 = vector.broadcast %cst_12 : f32 to vector<1x128xf32>
    %43 = arith.select %13, %41, %42 : vector<1x128xi1>, vector<1x128xf32>
    %cst_13 = arith.constant dense<0.000000e+00> : vector<1xf32>
    %44 = vector.multi_reduction <add>, %43, %cst_13 [1] : vector<1x128xf32> to vector<1xf32>
    %45 = vector.shape_cast %44 : vector<1xf32> to vector<1x1xf32>
    %c0_14 = arith.constant 0 : index
    %c0_15 = arith.constant 0 : index
    %c0_16 = arith.constant 0 : index
    %46 = vector.load %arg5[%c0_14, %c0_15, %c0_16] : memref<1x1x1xf32, #tpu.memory_space<vmem>>, vector<1x1x1xf32>
    %47 = vector.shape_cast %45 : vector<1x1xf32> to vector<1x1x1xf32>
    %48 = arith.addf %46, %47 : vector<1x1x1xf32>
    %c0_17 = arith.constant 0 : index
    %c0_18 = arith.constant 0 : index
    %c0_19 = arith.constant 0 : index
    %49 = vector.load %arg5[%c0_17, %c0_18, %c0_19] : memref<1x1x1xf32, #tpu.memory_space<vmem>>, vector<1x1x1xf32>
    tpu.vector_store %arg5[%c0_17, %c0_18, %c0_19], %48 {strides = array<i32>} : memref<1x1x1xf32, #tpu.memory_space<vmem>>, vector<1x1x1xf32>,
    return
  }
  func.func @transform_0(%arg0: i32, %arg1: i32) -> (i32, i32) {
    %c1_i32 = arith.constant 1 : i32
    %0 = arith.muli %arg0, %c1_i32 : i32
    %1 = arith.addi %0, %arg1 : i32
    %c0_i32 = arith.constant 0 : i32
    %2 = arith.minsi %1, %c0_i32 : i32
    %c0_i32_0 = arith.constant 0 : i32
    %c0_i32_1 = arith.constant 0 : i32
    return %c0_i32_0, %2 : i32, i32
  }
  func.func @transform_1(%arg0: i32, %arg1: i32) -> (i32, i32) {
    %c1_i32 = arith.constant 1 : i32
    %0 = arith.muli %arg0, %c1_i32 : i32
    %1 = arith.addi %0, %arg1 : i32
    %c0_i32 = arith.constant 0 : i32
    %2 = arith.minsi %1, %c0_i32 : i32
    %c0_i32_0 = arith.constant 0 : i32
    %c0_i32_1 = arith.constant 0 : i32
    return %c0_i32_0, %2 : i32, i32
  }
  func.func @transform_2(%arg0: i32, %arg1: i32) -> (i32, i32) {
    %c1_i32 = arith.constant 1 : i32
    %0 = arith.muli %arg0, %c1_i32 : i32
    %1 = arith.addi %0, %arg1 : i32
    %c0_i32 = arith.constant 0 : i32
    %2 = arith.minsi %1, %c0_i32 : i32
    %c0_i32_0 = arith.constant 0 : i32
    %c0_i32_1 = arith.constant 0 : i32
    return %c0_i32_0, %2 : i32, i32
  }
  func.func @transform_3(%arg0: i32, %arg1: i32) -> (i32, i32, i32) {
    %c0_i32 = arith.constant 0 : i32
    %c0_i32_0 = arith.constant 0 : i32
    %c0_i32_1 = arith.constant 0 : i32
    return %arg0, %c0_i32, %c0_i32_0 : i32, i32, i32
  }
}

</mosaic_0001>

<bundles_post_ra>
// kernel: tpu_custom_call.1
= control target key start
LH: loop header
LB: loop body
LE: loop exit
PB: predicated region body
PF: predicated region fallthrough
CT: control target
= control target key end

     0   :  { %s527_s12 = smov 0   ;;  %s529_s13 = smov 0   ;;  %s588_s0 = inlined_call_operand.vmem [shape: f32[16,8], index: 0, kind: input, shape index: {}]   ;;  %s589_s1 = inlined_call_operand.vmem [shape: s32[1,8], index: 1, kind: input, shape index: {}]   ;;  %s590_s2 = inlined_call_operand.vmem [shape: f32[16,8], index: 2, kind: input, shape index: {}]   ;;  %s591_s3 = inlined_call_operand.vmem [shape: f32[2,1,1], index: 3, kind: output, shape index: {}]  }
   0x1   :  { %s531_s14 = smov 0  }
   0x2 LB: > { %s25_s15 = sadd.s32 1, %s500_s13  ;;  %p433_p0 = scmp.ge.s32.totalorder %s504_s14, 1  ;;  %s504_s14 = sphi %s531_s14, %s13_s14   ;;  %s500_s13 = sphi %s529_s13, %s593_s13   ;;  %s496_s12 = sphi %s527_s12, %s592_s12  }
   0x3   : > { %p27_p1 = scmp.ge.s32.totalorder %s25_s15, 2  ;;  %p201_p2 = scmp.lt.s32.totalorder %s504_s14, 3 }
   0x5   : > { %s595_s15 = smov (%p27_p1, %s25_s15), 0  ;;  %p202_p3 = pnand %p433_p0, %p201_p2 }
   0x6   : > { %p239_p4 = scmp.lt.s32.totalorder (!%p202_p3), %s496_s12, 0  ;;  %p267_p5 = scmp.lt.s32.totalorder (!%p202_p3), %s496_s12, 1  ;;  %vm274_vm0 = vcmask (!%p202_p3), 0   ;;  %v506_v0 = vmov (!%p202_p3), 0.0   ;;  %v282_v14 = vlaneseq (!%p202_p3) }
   0x7   : > { %205 = sbr.rel (%p202_p3) target bundleno = 245 (0xf5), region = 32  ;;  %s445_s4 = sshll.u32 (!%p202_p3), %s496_s12, 7 }
   0x8   : > { %v314_v16 = vshrl.u32 (!%p202_p3), %v282_v14, 7  ;;  %v283_v51 = vand.u32 (!%p202_p3), 127, %v282_v14  ;;  %v285_v52 = vstv (!%p202_p3), %s445_s4 }
   0xa   : > { %v315_v20 = vadd.s32 (!%p202_p3), 8, %v314_v16  ;;  %v286_v56 = vadd.s32 (!%p202_p3), %v285_v52, %v283_v51 }
   0xc   : > { %vm287_vm3 = vcmp.lt.s32.totalorder (!%p202_p3), %v286_v56, 8 }
   0xe   : > { %s240_s16 = scalar_select %p239_p4, %s496_s12, 0 }
   0xf   : > { %s268_s17 = scalar_select %p267_p5, %s496_s12, 1 }
  0x10   : > { %s597_s16 = smov (!%p239_p4, %s240_s16), 0 }
  0x11   : > { %s556_s20 = scalar_lea.vmem %s591_s3, %s268_s17  ;;  %s437_s21 = sshll.u32 %s597_s16, 3 }
  0x12   : > { %275 = vst.msk [vmem:[%s556_s20] sm:$0x1] %vm274_vm0, %v506_v0  ;;  %s244_s24 = scalar_lea.vmem %s588_s0, %s437_s21  ;;  %s253_s27 = scalar_lea.vmem %s589_s1, %s597_s16 }
  0x13   : > { %v276_v1 = vld [vmem:[%s244_s24] sm:$0xff]  ;;  %v277_v2 = vld [vmem:[%s244_s24 + $0x8] sm:$0xff]  ;;  %s263_s30 = scalar_lea.vmem %s590_s2, %s437_s21 }
  0x14   : > { %v288_v3 = vmax.f32 %v276_v1, %v277_v2  ;;  %v446_v21 = vld [vmem:[%s253_s27] ss:$0 sm:$0xff]  ;;  %v279_v35 = vld [vmem:[%s263_s30 + $0x8] sm:$0xff] }
  0x15   : > { %vm320_vm1 = vcmp.eq.s32.totalorder %v314_v16, %v446_v21  ;;  %vm321_vm2 = vcmp.eq.s32.totalorder %v315_v20, %v446_v21  ;;  %v278_v34 = vld [vmem:[%s263_s30] sm:$0xff] }
  0x16   : > { %v289_v4 = vrot.slane %v288_v3, 4 }
  0x18   : > { %v290_v5 = vmax.f32 %v288_v3, %v289_v4 }
  0x19   : > { %v349_v62 = vld [vmem:[%s556_s20] sm:$0x1] }
  0x1a   : > { %v291_v6 = vrot.slane %v290_v5, 2 }
  0x1c   : > { %v292_v7 = vmax.f32 %v290_v5, %v291_v6 }
  0x1e   : > { %v293_v8 = vrot.slane %v292_v7, 1 }
  0x20   : > { %v294_v9 = vmax.f32 %v292_v7, %v293_v8 }
  0x22   : > { %v295_v10 = vsub.f32 %v276_v1, %v294_v9  ;;  %v296_v11 = vsub.f32 %v277_v2, %v294_v9 }
  0x24   : > { %v297_v12 = vmul.f32 1.442695, %v295_v10  ;;  %v299_v13 = vmul.f32 1.442695, %v296_v11  ;;  %v322_v25 = vsel %vm320_vm1, %v295_v10, 0.0  ;;  %v323_v26 = vsel %vm321_vm2, %v296_v11, 0.0 }
  0x25   : > { %v324_v29 = vadd.f32 %v323_v26, %v322_v25 }
  0x26   : > { %474 = vpow2.f32 %v297_v12 }
  0x27   : > { %476 = vpow2.f32 %v299_v13  ;;  %v325_v30 = vrot.slane %v324_v29, 4 }
  0x29   : > { %v326_v31 = vadd.f32 %v325_v30, %v324_v29 }
  0x2b   : > { %v327_v32 = vrot.slane %v326_v31, 2 }
  0x2d   : > { %v328_v38 = vadd.f32 %v327_v32, %v326_v31 }
  0x2f   : > { %v329_v43 = vrot.slane %v328_v38, 1 }
  0x30   : > { %v475_v15 = vpop.eup %474 }
  0x31   : > { %v477_v17 = vpop.eup %476  ;;  %v330_v48 = vadd.f32 %v329_v43, %v328_v38 }
  0x32   : > { %v301_v18 = vadd.f32 %v477_v17, %v475_v15 }
  0x34   : > { %v302_v19 = vrot.slane %v301_v18, 4 }
  0x36   : > { %v303_v22 = vadd.f32 %v302_v19, %v301_v18 }
  0x38   : > { %v304_v23 = vrot.slane %v303_v22, 2 }
  0x3a   : > { %v305_v24 = vadd.f32 %v304_v23, %v303_v22 }
  0x3c   : > { %v306_v27 = vrot.slane %v305_v24, 1 }
  0x3e   : > { %v307_v28 = vadd.f32 %v306_v27, %v305_v24 }
  0x40   : > { %478 = vrcp.f32 %v307_v28 }
  0x41   : > { %480 = vlog2.f32 %v307_v28 }
  0x4a   : > { %v479_v33 = vpop.eup %478 }
  0x4b   : > { %v311_v36 = vmul.f32 %v479_v33, %v475_v15  ;;  %v312_v37 = vmul.f32 %v479_v33, %v477_v17  ;;  %v481_v45 = vpop.eup %480 }
  0x4c   : > { %v309_v47 = vmul.f32 0.6931472, %v481_v45 }
  0x4d   : > { %v332_v39 = vsub.f32 %v311_v36, %v278_v34  ;;  %v333_v40 = vsub.f32 %v312_v37, %v279_v35 }
  0x4e   : > { %v331_v53 = vsub.f32 %v309_v47, %v330_v48 }
  0x4f   : > { %v334_v41 = vmul.f32 %v332_v39, %v332_v39  ;;  %v335_v42 = vmul.f32 %v333_v40, %v333_v40 }
  0x50   : > { %v343_v58 = vmul.f32 0.125, %v331_v53 }
  0x51   : > { %v336_v44 = vadd.f32 %v335_v42, %v334_v41 }
  0x53   : > { %v337_v46 = vrot.slane %v336_v44, 4 }
  0x55   : > { %v338_v49 = vadd.f32 %v337_v46, %v336_v44 }
  0x57   : > { %v339_v50 = vrot.slane %v338_v49, 2 }
  0x59   : > { %v340_v54 = vadd.f32 %v339_v50, %v338_v49 }
  0x5b   : > { %v341_v55 = vrot.slane %v340_v54, 1 }
  0x5d   : > { %v342_v57 = vadd.f32 %v341_v55, %v340_v54 }
  0x5f   : > { %v344_v59 = vmul.f32 0.0078125, %v342_v57 }
  0x61   : > { %v345_v60 = vadd.f32 %v344_v59, %v343_v58 }
  0x63   : > { %v346_v61 = vsel %vm287_vm3, %v345_v60, 0.0 }
  0x64   : > { %347 = vadd.xlane.f32.xlu0 %v346_v61 }
  0xf1   : > { %v348_v63 = vpop.xlane.xlu0 %347 }
  0xf2   : > { %v350_v0 = vadd.f32 %v349_v62, %v348_v63 }
  0xf4   : > { %352 = vst.msk [vmem:[%s556_s20] sm:$0x1] %vm274_vm0, %v350_v0 }
  0xf5 PF: > { %s13_s14 = sadd.s32 1, %s504_s14   ;;  %s592_s12 = smov %s500_s13 }
  0xf6   : > { %p10_p6 = scmp.ge.s32.totalorder %s13_s14, 4   ;;  %s593_s13 = smov %s595_s15 }
  0xf8   :  { %12 = sbr.rel (!%p10_p6) target bundleno = 2 (0x2), region = 72 }

</bundles_post_ra>
